<compile_context>
chip_gen: v7x
topology: tpu7x:2x2x1
jax: 0.10.0
libtpu: 0.0.40
codegen_flags: <defaults>
</compile_context>

<pallas_src>
import jax
import jax.numpy as jnp
from jax import lax
from jax.experimental import pallas as pl
from jax.experimental.pallas import tpu as pltpu


# ------------------------------ Pallas kernel ------------------------------

def v_head_kernel(h_ref, w_ref, o_ref):
    # h_ref: (TM, H) hidden-states tile, w_ref: (1, H) weight, o_ref: (1, TM).
    h = h_ref[...]
    # Trace-time decision: only materialize the cast when dtypes differ
    # (matches `.to(self.v_head_dtype)`; skipping it frees VALU slots / VMEM).
    if h.dtype != w_ref.dtype:
        h = h.astype(w_ref.dtype)
    # Swapped operands -> lane-dense (1, TM) result: contract the H axes of
    # (1, H) x (TM, H) with an f32 accumulator on the MXU.
    o_ref[...] = lax.dot_general(
        w_ref[...], h,
        dimension_numbers=(((1,), (1,)), ((), ())),
        preferred_element_type=jnp.float32,
    ).astype(o_ref.dtype)


def _pick_tile_rows(bs, h, itemsize, per_buffer_budget_bytes=12 << 20):
    """Row-tile size for the (BS, H) slab.

    * No artificial cap: TM = budget // (H*itemsize) (mem-bound kernels want
      the biggest block VMEM allows), rounded down to a multiple of 128 so
      tiled lane-dense (1, TM) output blocks stay unmasked.
    * If the whole slab fits one tile but is large enough to split into two
      >=128-row halves, split it so the "parallel" grid axis shards across
      both v7x TensorCores (neutral on v5e/v6e).
    """
    bytes_per_row = max(1, h * itemsize)
    max_rows = max(1, per_buffer_budget_bytes // bytes_per_row)
    if bs <= max_rows:
        if bs >= 256:
            # Split for megacore: two (or more) full 128-aligned tiles.
            return max(128, ((bs // 2) // 128) * 128)
        # Tiny slab: single full-extent block (always layout-legal).
        return bs
    return max(128, (max_rows // 128) * 128)


def v_head_pallas(hidden_states, w, *, tile_rows=None):
    """hidden_states: (B, S, H); w: (1, H) = nn.Linear(H, 1, bias=False).weight.

    Returns v: (B, S) in w.dtype  (== v_head(hidden_states.to(w.dtype)).squeeze(-1))
    """
    B, S, H = hidden_states.shape
    BS = B * S
    h2d = hidden_states.reshape(BS, H)

    if tile_rows is None:
        tile_rows = _pick_tile_rows(BS, H, h2d.dtype.itemsize)
    tm = BS if BS <= tile_rows else tile_rows
    grid = (pl.cdiv(BS, tm),)

    out = pl.pallas_call(
        v_head_kernel,
        # Lane-dense output slab: (1, BS), last dim maps to lanes.
        out_shape=jax.ShapeDtypeStruct((1, BS), w.dtype),
        grid=grid,
        in_specs=[
            # Hidden-states tile: rows pipelined (double-buffered) across grid.
            pl.BlockSpec((tm, H), lambda i: (i, 0)),
            # Weight row: constant index_map -> DMA'd once, resident in VMEM.
            pl.BlockSpec((1, H), lambda i: (0, 0)),
        ],
        out_specs=pl.BlockSpec((1, tm), lambda i: (0, i)),
        compiler_params=pltpu.CompilerParams(
            # Each output tile is independent -> "parallel" (megacore on v7x).
            dimension_semantics=("parallel",),
            # 2 x 12 MiB double-buffered hidden tile + weight + output fits
            # comfortably; avoids v5e's 16 MiB scoped-VMEM default overrun and
            # stays inside v7x's 64 MiB physical VMEM.
            vmem_limit_bytes=48 << 20,
        ),
    )(h2d, w)

    return out.reshape(B, S)


# ----------------------- Synthetic "base model" glue -----------------------

def synthetic_base_model(input_ids, attention_mask, embed_table, out_dtype=None):
    """Deterministic stand-in for the pretrained causal LM: returns the 'last
    hidden state' as an embedding lookup (plain JAX glue).

    If `out_dtype` is narrower than the table dtype, the cast is fused into
    the producer (table cast before the gather) so the reward head reads half
    the HBM bytes -- the `.to(v_head_dtype)` semantics are preserved."""
    if out_dtype is not None and jnp.dtype(out_dtype).itemsize < embed_table.dtype.itemsize:
        embed_table = embed_table.astype(out_dtype)
    hidden = embed_table[input_ids]  # (B, S, H)
    # attention_mask participates in the real model's attention; accepted for
    # signature parity (HF returns full-length hidden states regardless).
    del attention_mask
    return hidden


def reward_model_forward(input_ids, attention_mask, embed_table, v_head_w):
    hidden_states = synthetic_base_model(
        input_ids, attention_mask, embed_table, out_dtype=v_head_w.dtype)
    # Any remaining (upcast / no-op) `.to(self.v_head_dtype)` cast happens
    # in-register inside the Pallas kernel (no extra full-slab HBM round trip).
    v = v_head_pallas(hidden_states, v_head_w)  # squeeze(-1) inside wrapper
    return v


# ---------------------------------- main -----------------------------------

if __name__ == "__main__":
    B, S, H, VOCAB = 2, 8, 32, 64

    key = jax.random.PRNGKey(0)
    k_emb, k_w, k_ids = jax.random.split(key, 3)

    embed_table = jax.random.normal(k_emb, (VOCAB, H), dtype=jnp.float32)
    # nn.Linear(H, 1, bias=False).weight has shape (1, H)
    v_head_w = jax.random.normal(k_w, (1, H), dtype=jnp.float32) * (1.0 / jnp.sqrt(H))

    input_ids = jax.random.randint(k_ids, (B, S), 0, VOCAB, dtype=jnp.int32)
    attention_mask = jnp.ones((B, S), dtype=jnp.int32)

    v = reward_model_forward(input_ids, attention_mask, embed_table, v_head_w)
    v = jax.block_until_ready(v)

    # Reference check in plain JAX.
    hidden_ref = embed_table[input_ids].astype(v_head_w.dtype)
    v_ref = jnp.einsum("bsh,oh->bso", hidden_ref, v_head_w)[..., 0]
    assert v.shape == (B, S), v.shape
    assert v.dtype == v_head_w.dtype, v.dtype
    assert jnp.allclose(v, v_ref, atol=1e-5, rtol=1e-5), (v, v_ref)

    print("KERNEL_OK")
</pallas_src>

<mosaic_0001>
module attributes {stable_mosaic.version = 11 : i64} {
  func.func @v_head_kernel(%arg0: i32, %arg1: memref<16x32xf32, #tpu.memory_space<vmem>>, %arg2: memref<1x32xf32, #tpu.memory_space<vmem>>, %arg3: memref<1x16xf32, #tpu.memory_space<vmem>>) attributes {dimension_semantics = [#tpu.dimension_semantics<parallel>], iteration_bounds = array<i64: 1>, scalar_prefetch = 0 : i64, scratch_operands = 0 : i64, tpu.core_type = #tpu.core_type<tc>, window_params = [{transform_indices = @transform_0, window_bounds = array<i64: 16, 32>}, {pipeline_mode = #tpu.pipeline_mode<synchronous>, transform_indices = @transform_1, window_bounds = array<i64: 1, 32>}, {transform_indices = @transform_2, window_bounds = array<i64: 1, 16>}]} {
    %c0 = arith.constant 0 : index
    %c0_0 = arith.constant 0 : index
    %0 = vector.load %arg1[%c0, %c0_0] : memref<16x32xf32, #tpu.memory_space<vmem>>, vector<16x32xf32>
    %c0_1 = arith.constant 0 : index
    %c0_2 = arith.constant 0 : index
    %1 = vector.load %arg2[%c0_1, %c0_2] : memref<1x32xf32, #tpu.memory_space<vmem>>, vector<1x32xf32>
    %cst = arith.constant dense<0.000000e+00> : vector<1x16xf32>
    %2 = tpu.matmul %1, %0, %cst {dimension_numbers = #tpu.dot_dimension_numbers<[1], [1], [0], [0], [0, 0, 1, 0], [], []>} : vector<1x32xf32>, vector<16x32xf32>, vector<1x16xf32> -> vector<1x16xf32>
    %c0_3 = arith.constant 0 : index
    %c0_4 = arith.constant 0 : index
    %3 = vector.load %arg3[%c0_3, %c0_4] : memref<1x16xf32, #tpu.memory_space<vmem>>, vector<1x16xf32>
    tpu.vector_store %arg3[%c0_3, %c0_4], %2 {strides = array<i32>} : memref<1x16xf32, #tpu.memory_space<vmem>>, vector<1x16xf32>,
    return
  }
  func.func @transform_0(%arg0: i32) -> (i32, i32) {
    %c0_i32 = arith.constant 0 : i32
    %c0_i32_0 = arith.constant 0 : i32
    return %arg0, %c0_i32 : i32, i32
  }
  func.func @transform_1(%arg0: i32) -> (i32, i32) {
    %c0_i32 = arith.constant 0 : i32
    %c0_i32_0 = arith.constant 0 : i32
    %c0_i32_1 = arith.constant 0 : i32
    return %c0_i32, %c0_i32_0 : i32, i32
  }
  func.func @transform_2(%arg0: i32) -> (i32, i32) {
    %c0_i32 = arith.constant 0 : i32
    %c0_i32_0 = arith.constant 0 : i32
    return %c0_i32, %arg0 : i32, i32
  }
}

</mosaic_0001>

<bundles_post_ra>
// kernel: tpu_custom_call.1
= control target key start
LH: loop header
LB: loop body
LE: loop exit
PB: predicated region body
PF: predicated region fallthrough
CT: control target
= control target key end

     0   :  { %7 = vsyncpa [#allocation3], 0  ;;  %s247_s0 = inlined_call_operand.hbm [shape: f32[16,32], index: 0, kind: input, shape index: {}]   ;;  %s248_s1 = inlined_call_operand.vmem [shape: f32[1,32], index: 1, kind: input, shape index: {}]   ;;  %s249_s2 = inlined_call_operand.hbm [shape: f32[1,16], index: 2, kind: output, shape index: {}]  }
   0x1   :  { %8 = vsyncpa [#allocation4], 0  ;;  %s198_s9 = smov [#allocation2]   ;;  %s150_s13 = scalar_lea.hbm %s247_s0, 256 }
   0x2   :  { %s14_s10 = sshll.u32 %s198_s9, 4  ;;  %p151_p0 = scmp.ne.s32.totalorder %s247_s0, %s150_s13  ;;  %s15_s10 = int_to_ptr.vmem [resolvable:$true] %s14_s10 }
   0x3   :  { %p154_p1 = scmp.lt.u32.totalorder %s150_s13, %s247_s0 }
   0x5   :  { %p156_p2 = pnand %p154_p1, %p151_p0 }
   0x7   :  { %159 = shalt.err (!%p156_p2)
}
   0x8   :  { %s160_s18 = scalar_lea.vmem %s15_s10, 256  ;;  %p165_p4 = scmp.lt.s32.totalorder %s15_s10, %s15_s10 }
   0x9   :  { %p161_p3 = scmp.ne.s32.totalorder %s15_s10, %s160_s18  ;;  %p166_p5 = scmp.lt.s32.totalorder %s160_s18, %s160_s18 }
   0xb   :  { %p167_p6 = por %p166_p5, %p165_p4 }
   0xd   :  { %p168_p7 = pnand %p167_p6, %p161_p3 }
   0xf   :  { %171 = shalt.err (!%p168_p7)
}
  0x10   :  { %s199_s19 = smov 128   ;;  %s200_s20 = smov 8  }
  0x11   :  { %20 = dma.hbm_to_vmem [thread:$0]  %s247_s0, 256, %s15_s10, [#allocation3], %s199_s19, %s199_s19, %s200_s20  }
  0x12   :  { %194 = dma.done.wait [#allocation3], 256  }
  0x13   :  { %195 = vsyncadd [#allocation3], 4294967040  ;;  %v201_v0 = vmov 0.0|0.0   ;;  %vm202_vm0 = vmmov 0   ;;  %v203_v1 = vmov 0.0   ;;  %vm29_vm1 = vcmask 261120  }
  0x14   :  { %139 = vmatprep.subr.bf16.mxu0 %v201_v0  ;;  %136 = vmatprep.mubr.msk.f32.mxu0 %vm202_vm0, %v203_v1  ;;  %v26_v2 = vld [vmem:[#allocation2] sm:$0xff]  ;;  %v27_v3 = vld [vmem:[#allocation2 + $0x8] sm:$0xff]  ;;  %vm141_vm2 = vmpackc.low %vm29_vm1, %vm29_vm1  ;;  %s204_s25 = smov [#allocation5]   ;;  %vm109_vm3 = vcmask 122880  }
  0x15   :  { %v140_v4 = vpack.c.bf16 %v27_v3, %v26_v2  ;;  %v28_v5 = vld [vmem:[%s248_s1] sm:$0x1]  ;;  %s117_s0 = sshll.u32 %s204_s25, 4  ;;  %s118_s0 = int_to_ptr.vmem [resolvable:$true] %s117_s0 }
  0x16   :  { %s172_s26 = scalar_lea.vmem %s118_s0, 16  ;;  %s176_s27 = scalar_lea.vmem %s118_s0, 32 }
  0x17   :  { %142 = vmatpush3.bf16.xpose.msk.msra.mxu0 %vm141_vm2, %v140_v4  ;;  %p173_p8 = scmp.ne.s32.totalorder %s118_s0, %s172_s26  ;;  %p177_p9 = scmp.lt.s32.totalorder %s118_s0, %s118_s0 }
  0x18   :  { %p178_p10 = scmp.lt.s32.totalorder %s176_s27, %s172_s26 }
  0x1a   :  { %p179_p11 = por %p178_p10, %p177_p9 }
  0x1c   :  { %p180_p12 = pnand %p179_p11, %p173_p8 }
  0x1e   :  { %137 = vmatmul.mubr.msk.f32.vlgmr.msra.gmra.mrb[0].mxu0 %vm29_vm1, %v28_v5 }
  0xf1   :  { %v105_v6 = vpop.f32.mrb[0].mxu0 }
  0xf2   :  { %v138_v7 = vpop.f32.mrb[1].mxu0  ;;  %110 = vst.msk [vmem:[#allocation5] sm:$0x1] %vm109_vm3, %v105_v6 }
  0xf3   :  { %183 = shalt.err (!%p180_p12)
}
  0xf4   :  { %s184_s1 = scalar_lea.hbm %s249_s2, 16 }
  0xf5   :  { %p185_p13 = scmp.ne.s32.totalorder %s249_s2, %s184_s1  ;;  %p188_p0 = scmp.lt.u32.totalorder %s184_s1, %s249_s2 }
  0xf7   :  { %p190_p1 = pnand %p188_p0, %p185_p13 }
  0xf9   :  { %193 = shalt.err (!%p190_p1)
}
  0xfa   :  { %120 = dma.vmem_to_hbm [thread:$0]  %s118_s0, 16, %s249_s2, [#allocation4]  }
  0xfb   :  { %196 = dma.done.wait [#allocation4], 16  }
  0xfc   :  { %197 = vsyncadd [#allocation4], 4294967280 }
  0xfd   :  { %124 = vsyncpa [#allocation3], 1 }
  0xfe   :  { %125 = vsyncpa [#allocation4], 1 }

</bundles_post_ra>
